<compile_context>
chip_gen: v7x
topology: tpu7x:2x2x1
jax: 0.10.0
libtpu: 0.0.40
codegen_flags: <defaults>
</compile_context>

<pallas_src>
import functools

import jax
import jax.numpy as jnp
import numpy as np
from jax.experimental import pallas as pl
from jax.experimental.pallas import tpu as pltpu


def self_attention_kernel(maxlen_ref,                 # SMEM scalar prefetch (1,)
                          x_ref, w_ref, len_ref,      # VMEM inputs
                          rep_ref, scores_ref,        # VMEM outputs
                          *, non_linearity):
    # x_ref:      (bt, T, H)  inputs tile (native dtype)
    # w_ref:      (1, 1, H)   attention weight row vector (f32)
    # len_ref:    (bt, 1, 1)  per-row valid lengths (int32)
    # maxlen_ref: (1,)        global max(lengths) — exact torch get_mask semantics
    # rep_ref:    (bt, 1, H)  weighted-sum representations
    # scores_ref: (bt, 1, T)  normalized attention scores
    bt = x_ref.shape[0]
    H = x_ref.shape[2]

    x = x_ref[...]                                          # (bt, T, H) native dtype
    w = jnp.broadcast_to(w_ref[...], (bt, 1, H)).astype(x.dtype)

    # MXU: pre[b, 0, t] = sum_h w[h] * x[b, t, h]   (no (bt,T,H) broadcast slab)
    pre = jnp.einsum("bqh,bth->bqt", w, x,
                     preferred_element_type=jnp.float32)    # (bt, 1, T) f32
    s = non_linearity(pre)

    # Masked softmax with a single normalization: the plain-softmax denominator
    # cancels against the post-mask renormalization, so only exp + mask + one
    # reduce + one scale remain (bit-equivalent up to fp rounding).
    m = jnp.max(s, axis=-1, keepdims=True)                  # (bt, 1, 1)
    e = jnp.exp(s - m)                                      # (bt, 1, T)

    lens = len_ref[...]                                     # (bt, 1, 1) int32
    max_len = maxlen_ref[0]
    t_pos = jax.lax.broadcasted_iota(jnp.int32, e.shape, 2)
    keep = jnp.logical_or(lens >= max_len, t_pos < lens)    # torch get_mask rule
    masked = jnp.where(keep, e, 0.0)                        # (bt, 1, T)

    denom = jnp.sum(masked, axis=-1, keepdims=True)         # (bt, 1, 1)
    # EUP approx reciprocal + one Newton step (tiny array) instead of a
    # full-width VPU divide.
    r = pl.reciprocal(denom, approx=True)
    r = r * (2.0 - denom * r)
    scores = masked * r                                     # (bt, 1, T) f32

    # MXU: rep[b, 0, h] = sum_t scores[b, 0, t] * x[b, t, h]
    rep = jnp.einsum("bqt,bth->bqh", scores.astype(x.dtype), x,
                     preferred_element_type=jnp.float32)    # (bt, 1, H) f32

    rep_ref[...] = rep.astype(rep_ref.dtype)
    scores_ref[...] = scores.astype(scores_ref.dtype)


_TARGET_TILE_BYTES = 8 * 1024 * 1024   # per-buffer input tile budget (v7x-safe)


def _round_up(x, m):
    return (x + m - 1) // m * m


def _pick_batch_tile(B, T, H, itemsize):
    """Batch tile: whole batch when tiny; otherwise the largest multiple of 8
    rows whose input tile stays ~8 MiB, capped so the grid has >= 2 steps
    (both v7x TensorCores get work)."""
    if B <= 8:
        return B
    row_bytes = max(T * H * itemsize, 1)
    cap = max(8, (_TARGET_TILE_BYTES // row_bytes) // 8 * 8)
    two_way = max(8, _round_up(-(-B // 2), 8))   # ceil(B/2) rounded up to 8
    return min(cap, two_way, _round_up(B, 8))


def self_attention(inputs, attention_weights, lengths, *, non_linearity="tanh"):
    """inputs: (B, T, H) float; attention_weights: (H,); lengths: (B,) int."""
    B, T, H = inputs.shape
    in_dtype = inputs.dtype
    w3 = attention_weights.reshape(1, 1, H).astype(jnp.float32)
    lens3 = lengths.reshape(B, 1, 1).astype(jnp.int32)
    max_len = jnp.max(lengths).astype(jnp.int32).reshape(1)   # scalar prefetch

    if non_linearity == "relu":
        nl = lambda v: jnp.maximum(v, 0.0)
    else:
        nl = jnp.tanh

    bt = _pick_batch_tile(B, T, H, jnp.dtype(in_dtype).itemsize)
    grid = (pl.cdiv(B, bt),)

    kernel = functools.partial(self_attention_kernel, non_linearity=nl)

    grid_spec = pltpu.PrefetchScalarGridSpec(
        num_scalar_prefetch=1,
        grid=grid,
        in_specs=[
            pl.BlockSpec((bt, T, H), lambda i, ml: (i, 0, 0)),   # inputs tile
            pl.BlockSpec((1, 1, H), lambda i, ml: (0, 0, 0)),    # weights (shared)
            pl.BlockSpec((bt, 1, 1), lambda i, ml: (i, 0, 0)),   # lengths tile
        ],
        out_specs=(
            pl.BlockSpec((bt, 1, H), lambda i, ml: (i, 0, 0)),   # representations
            pl.BlockSpec((bt, 1, T), lambda i, ml: (i, 0, 0)),   # scores
        ),
    )

    rep3, scores3 = pl.pallas_call(
        kernel,
        out_shape=(jax.ShapeDtypeStruct((B, 1, H), in_dtype),
                   jax.ShapeDtypeStruct((B, 1, T), in_dtype)),
        grid_spec=grid_spec,
        compiler_params=pltpu.CompilerParams(
            dimension_semantics=("parallel",),        # batch tiles independent
            vmem_limit_bytes=48 * 1024 * 1024),       # > 16/32 MiB scoped defaults
    )(max_len, inputs, w3, lens3)
    return rep3.reshape(B, H), scores3.reshape(B, T)


def _reference(inputs, attention_weights, lengths, non_linearity="tanh"):
    """Pure-JAX mirror of the torch forward."""
    nl = (lambda v: jnp.maximum(v, 0.0)) if non_linearity == "relu" else jnp.tanh
    pre = nl(jnp.einsum("bth,h->bt", inputs.astype(jnp.float32),
                        attention_weights.astype(jnp.float32)))
    p = jax.nn.softmax(pre, axis=-1)
    max_len = jnp.max(lengths)
    T = inputs.shape[1]
    t_pos = jnp.arange(T)[None, :]
    keep = jnp.logical_or(lengths[:, None] >= max_len, t_pos < lengths[:, None])
    masked = p * keep.astype(p.dtype)
    scores = masked / jnp.sum(masked, axis=-1, keepdims=True)
    rep = jnp.einsum("bth,bt->bh", inputs.astype(jnp.float32), scores)
    return rep, scores


if __name__ == "__main__":
    key = jax.random.PRNGKey(0)

    def run_case(B, T, H, lengths):
        k_x, k_w = jax.random.split(jax.random.fold_in(key, B * 1000 + T))
        inputs = jax.random.normal(k_x, (B, T, H), dtype=jnp.float32)
        # Matches nn.init.uniform(self.attention_weights.data, -0.005, 0.005)
        attention_weights = jax.random.uniform(
            k_w, (H,), dtype=jnp.float32, minval=-0.005, maxval=0.005)

        rep, scores = self_attention(inputs, attention_weights, lengths)
        rep = jax.block_until_ready(rep)
        scores = jax.block_until_ready(scores)

        rep_ref, scores_ref = _reference(inputs, attention_weights, lengths)
        # Tolerance loosened slightly vs exact f32 divide: approx reciprocal
        # (+1 Newton step) and MXU accumulation order differ from the XLA ref.
        np.testing.assert_allclose(np.asarray(scores), np.asarray(scores_ref),
                                   atol=2e-4, rtol=2e-4)
        np.testing.assert_allclose(np.asarray(rep), np.asarray(rep_ref),
                                   atol=2e-4, rtol=2e-4)

    # Case 1: tiny batch (single grid step); one full-length row, one padded.
    run_case(2, 8, 32, jnp.array([7, 5], dtype=jnp.int32))

    # Case 2: B > 8 → multi-step grid with a partial last block (exercises the
    # tiling / dropped-OOB-write path).
    run_case(12, 16, 32,
             jnp.array([16, 12, 8, 5, 16, 3, 9, 16, 7, 1, 14, 10],
                       dtype=jnp.int32))

    print("KERNEL_OK")
</pallas_src>

<mosaic_0001>
module attributes {stable_mosaic.version = 11 : i64} {
  func.func @self_attention_kernel(%arg0: i32, %arg1: memref<1xi32, #tpu.memory_space<smem>>, %arg2: memref<2x8x32xf32, #tpu.memory_space<vmem>>, %arg3: memref<1x1x32xf32, #tpu.memory_space<vmem>>, %arg4: memref<2x1x1xi32, #tpu.memory_space<vmem>>, %arg5: memref<2x1x32xf32, #tpu.memory_space<vmem>>, %arg6: memref<2x1x8xf32, #tpu.memory_space<vmem>>) attributes {dimension_semantics = [#tpu.dimension_semantics<parallel>], iteration_bounds = array<i64: 1>, scalar_prefetch = 1 : i64, scratch_operands = 0 : i64, tpu.core_type = #tpu.core_type<tc>, window_params = [{transform_indices = @transform_0, window_bounds = array<i64: 2, 8, 32>}, {pipeline_mode = #tpu.pipeline_mode<synchronous>, transform_indices = @transform_1, window_bounds = array<i64: 1, 1, 32>}, {transform_indices = @transform_2, window_bounds = array<i64: 2, 1, 1>}, {transform_indices = @transform_3, window_bounds = array<i64: 2, 1, 32>}, {transform_indices = @transform_4, window_bounds = array<i64: 2, 1, 8>}]} {
    %c0 = arith.constant 0 : index
    %c0_0 = arith.constant 0 : index
    %c0_1 = arith.constant 0 : index
    %0 = vector.load %arg2[%c0, %c0_0, %c0_1] : memref<2x8x32xf32, #tpu.memory_space<vmem>>, vector<2x8x32xf32>
    %c0_2 = arith.constant 0 : index
    %c0_3 = arith.constant 0 : index
    %c0_4 = arith.constant 0 : index
    %1 = vector.load %arg3[%c0_2, %c0_3, %c0_4] : memref<1x1x32xf32, #tpu.memory_space<vmem>>, vector<1x1x32xf32>
    %2 = vector.shape_cast %1 : vector<1x1x32xf32> to vector<1x1x32xf32>
    %3 = vector.broadcast %2 : vector<1x1x32xf32> to vector<2x1x32xf32>
    "tpu.trace_start"() <{level = 10 : i32, message = "bqh,bth->bqt"}> : () -> ()
    %cst = arith.constant dense<0.000000e+00> : vector<2x1x8xf32>
    %4 = tpu.matmul %3, %0, %cst {dimension_numbers = #tpu.dot_dimension_numbers<[2], [2], [1], [1], [0, 0, 0, 1, 1, 1], [0], [0]>} : vector<2x1x32xf32>, vector<2x8x32xf32>, vector<2x1x8xf32> -> vector<2x1x8xf32>
    "tpu.trace_stop"() : () -> ()
    %5 = math.tanh %4 : vector<2x1x8xf32>
    %cst_5 = arith.constant dense<0xFF800000> : vector<2x1xf32>
    %6 = vector.multi_reduction <maximumf>, %5, %cst_5 [2] : vector<2x1x8xf32> to vector<2x1xf32>
    %7 = vector.shape_cast %6 : vector<2x1xf32> to vector<2x1x1xf32>
    %8 = vector.broadcast %7 : vector<2x1x1xf32> to vector<2x1x8xf32>
    %9 = arith.subf %5, %8 : vector<2x1x8xf32>
    %10 = math.exp %9 : vector<2x1x8xf32>
    %c0_6 = arith.constant 0 : index
    %c0_7 = arith.constant 0 : index
    %c0_8 = arith.constant 0 : index
    %11 = vector.load %arg4[%c0_6, %c0_7, %c0_8] : memref<2x1x1xi32, #tpu.memory_space<vmem>>, vector<2x1x1xi32>
    %c0_9 = arith.constant 0 : index
    %12 = memref.load %arg1[%c0_9] : memref<1xi32, #tpu.memory_space<smem>>
    %13 = tpu.iota {dimensions = array<i32: 2>} : vector<2x1x8xi32>
    %14 = vector.broadcast %12 : i32 to vector<2x1x1xi32>
    %15 = arith.cmpi sge, %11, %14 : vector<2x1x1xi32>
    %16 = vector.broadcast %11 : vector<2x1x1xi32> to vector<2x1x8xi32>
    %17 = arith.cmpi slt, %13, %16 : vector<2x1x8xi32>
    %18 = vector.broadcast %15 : vector<2x1x1xi1> to vector<2x1x8xi1>
    %19 = arith.ori %18, %17 : vector<2x1x8xi1>
    %cst_10 = arith.constant 0.000000e+00 : f32
    %20 = vector.broadcast %cst_10 : f32 to vector<2x1x8xf32>
    %21 = arith.select %19, %10, %20 : vector<2x1x8xi1>, vector<2x1x8xf32>
    %cst_11 = arith.constant dense<0.000000e+00> : vector<2x1xf32>
    %22 = vector.multi_reduction <add>, %21, %cst_11 [2] : vector<2x1x8xf32> to vector<2x1xf32>
    %23 = vector.shape_cast %22 : vector<2x1xf32> to vector<2x1x1xf32>
    %24 = tpu.reciprocal %23 {approx = true} : vector<2x1x1xf32> -> vector<2x1x1xf32>
    %25 = arith.mulf %23, %24 : vector<2x1x1xf32>
    %cst_12 = arith.constant 2.000000e+00 : f32
    %26 = vector.broadcast %cst_12 : f32 to vector<2x1x1xf32>
    %27 = arith.subf %26, %25 : vector<2x1x1xf32>
    %28 = arith.mulf %24, %27 : vector<2x1x1xf32>
    %29 = vector.broadcast %28 : vector<2x1x1xf32> to vector<2x1x8xf32>
    %30 = arith.mulf %21, %29 : vector<2x1x8xf32>
    "tpu.trace_start"() <{level = 10 : i32, message = "bqt,bth->bqh"}> : () -> ()
    %cst_13 = arith.constant dense<0.000000e+00> : vector<2x1x32xf32>
    %31 = tpu.matmul %30, %0, %cst_13 {dimension_numbers = #tpu.dot_dimension_numbers<[2], [1], [1], [2], [0, 0, 0, 1, 1, 2], [0], [0]>} : vector<2x1x8xf32>, vector<2x8x32xf32>, vector<2x1x32xf32> -> vector<2x1x32xf32>
    "tpu.trace_stop"() : () -> ()
    %c0_14 = arith.constant 0 : index
    %c0_15 = arith.constant 0 : index
    %c0_16 = arith.constant 0 : index
    %32 = vector.load %arg5[%c0_14, %c0_15, %c0_16] : memref<2x1x32xf32, #tpu.memory_space<vmem>>, vector<2x1x32xf32>
    tpu.vector_store %arg5[%c0_14, %c0_15, %c0_16], %31 {strides = array<i32>} : memref<2x1x32xf32, #tpu.memory_space<vmem>>, vector<2x1x32xf32>,
    %c0_17 = arith.constant 0 : index
    %c0_18 = arith.constant 0 : index
    %c0_19 = arith.constant 0 : index
    %33 = vector.load %arg6[%c0_17, %c0_18, %c0_19] : memref<2x1x8xf32, #tpu.memory_space<vmem>>, vector<2x1x8xf32>
    tpu.vector_store %arg6[%c0_17, %c0_18, %c0_19], %30 {strides = array<i32>} : memref<2x1x8xf32, #tpu.memory_space<vmem>>, vector<2x1x8xf32>,
    return
  }
  func.func @transform_0(%arg0: i32, %arg1: memref<1xi32, #tpu.memory_space<smem>>) -> (i32, i32, i32) {
    %c0_i32 = arith.constant 0 : i32
    %c0_i32_0 = arith.constant 0 : i32
    %c0_i32_1 = arith.constant 0 : i32
    return %arg0, %c0_i32, %c0_i32_0 : i32, i32, i32
  }
  func.func @transform_1(%arg0: i32, %arg1: memref<1xi32, #tpu.memory_space<smem>>) -> (i32, i32, i32) {
    %c0_i32 = arith.constant 0 : i32
    %c0_i32_0 = arith.constant 0 : i32
    %c0_i32_1 = arith.constant 0 : i32
    %c0_i32_2 = arith.constant 0 : i32
    return %c0_i32, %c0_i32_0, %c0_i32_1 : i32, i32, i32
  }
  func.func @transform_2(%arg0: i32, %arg1: memref<1xi32, #tpu.memory_space<smem>>) -> (i32, i32, i32) {
    %c0_i32 = arith.constant 0 : i32
    %c0_i32_0 = arith.constant 0 : i32
    %c0_i32_1 = arith.constant 0 : i32
    return %arg0, %c0_i32, %c0_i32_0 : i32, i32, i32
  }
  func.func @transform_3(%arg0: i32, %arg1: memref<1xi32, #tpu.memory_space<smem>>) -> (i32, i32, i32) {
    %c0_i32 = arith.constant 0 : i32
    %c0_i32_0 = arith.constant 0 : i32
    %c0_i32_1 = arith.constant 0 : i32
    return %arg0, %c0_i32, %c0_i32_0 : i32, i32, i32
  }
  func.func @transform_4(%arg0: i32, %arg1: memref<1xi32, #tpu.memory_space<smem>>) -> (i32, i32, i32) {
    %c0_i32 = arith.constant 0 : i32
    %c0_i32_0 = arith.constant 0 : i32
    %c0_i32_1 = arith.constant 0 : i32
    return %arg0, %c0_i32, %c0_i32_0 : i32, i32, i32
  }
}

</mosaic_0001>

<bundles_post_ra>
// kernel: tpu_custom_call.1
= control target key start
LH: loop header
LB: loop body
LE: loop exit
PB: predicated region body
PF: predicated region fallthrough
CT: control target
= control target key end

     0   :  { %12 = vsyncpa [#allocation5], 0  ;;  %s677_s0 = inlined_call_operand.<no memory space> [shape: s32[1], index: 0, kind: input, shape index: {}]   ;;  %s678_s1 = inlined_call_operand.hbm [shape: f32[2,8,32], index: 1, kind: input, shape index: {}]   ;;  %s679_s2 = inlined_call_operand.vmem [shape: f32[1,1,32], index: 2, kind: input, shape index: {}]   ;;  %s680_s3 = inlined_call_operand.vmem [shape: s32[2,1,1], index: 3, kind: input, shape index: {}]   ;;  %s681_s4 = inlined_call_operand.hbm [shape: f32[2,1,32], index: 4, kind: output, shape index: {0}]   ;;  %s682_s5 = inlined_call_operand.hbm [shape: f32[2,1,8], index: 5, kind: output, shape index: {1}]  }
   0x1   :  { %13 = vsyncpa [#allocation6], 0 }
   0x2   :  { %14 = vsyncpa [#allocation9], 0  ;;  %s579_s18 = smov [#allocation4]   ;;  %s507_s22 = scalar_lea.hbm %s678_s1, 256 }
   0x3   :  { %s20_s19 = sshll.u32 %s579_s18, 4  ;;  %p508_p0 = scmp.ne.s32.totalorder %s678_s1, %s507_s22  ;;  %s21_s19 = int_to_ptr.vmem [resolvable:$true] %s20_s19 }
   0x4   :  { %p511_p1 = scmp.lt.u32.totalorder %s507_s22, %s678_s1 }
   0x6   :  { %p513_p2 = pnand %p511_p1, %p508_p0 }
   0x8   :  { %516 = shalt.err (!%p513_p2)
}
   0x9   :  { %s517_s27 = scalar_lea.vmem %s21_s19, 256  ;;  %p522_p4 = scmp.lt.s32.totalorder %s21_s19, %s21_s19 }
   0xa   :  { %p518_p3 = scmp.ne.s32.totalorder %s21_s19, %s517_s27  ;;  %p523_p5 = scmp.lt.s32.totalorder %s517_s27, %s517_s27 }
   0xc   :  { %p524_p6 = por %p523_p5, %p522_p4 }
   0xe   :  { %p525_p7 = pnand %p524_p6, %p518_p3 }
  0x10   :  { %528 = shalt.err (!%p525_p7)
}
  0x11   :  { %s580_s28 = smov 128   ;;  %s581_s29 = smov 8  }
  0x12   :  { %26 = dma.hbm_to_vmem [thread:$0]  %s678_s1, 256, %s21_s19, [#allocation5], %s580_s28, %s580_s28, %s581_s29  }
  0x13   :  { %573 = dma.done.wait [#allocation5], 256  }
  0x14   :  { %574 = vsyncadd [#allocation5], 4294967040  ;;  %v582_v0 = vmov 0.0   ;;  %vm583_vm0 = vmmov 0   ;;  %vm37_vm1 = vcmask 261120   ;;  %v34_v1 = vld [vmem:[#allocation4] sm:$0xff]  ;;  %v207_v5 = vstv %s677_s0 }
  0x15   :  { %463 = vmatprep.subr.mxu0 %v582_v0  ;;  %465 = vmatprep.mubr.msk.f32.mxu0 %vm583_vm0, %v582_v0  ;;  %v35_v2 = vld [vmem:[#allocation4 + $0x8] sm:$0xff]  ;;  %v36_v3 = vld [vmem:[%s679_s2] sm:$0x1]  ;;  %v584_v6 = vmov 0   ;;  %v203_v8 = vld [vmem:[%s680_s3 + $0x1] sm:$0x1]  ;;  %v205_v19 = vlaneseq }
  0x16   :  { %468 = vmatprep.subr.mxu1 %v582_v0  ;;  %470 = vmatprep.mubr.msk.f32.mxu1 %vm583_vm0, %v582_v0  ;;  %v202_v4 = vld [vmem:[%s680_s3] sm:$0x1]  ;;  %vm209_vm3 = vcmp.ge.s32.totalorder %v203_v8, %v207_v5  ;;  %vm189_vm4 = vcmask 57344   ;;  %vm264_vm11 = vcmask 64512   ;;  %s585_s0 = smov [#allocation8]  }
  0x17   :  { %464 = vmatpush3.xpose.msk.msra.mxu0 %vm37_vm1, %v34_v1  ;;  %469 = vmatpush3.xpose.msk.msra.mxu1 %vm37_vm1, %v35_v2  ;;  %vm208_vm2 = vcmp.ge.s32.totalorder %v202_v4, %v207_v5  ;;  %v227_v9 = vsel %vm209_vm3, 1, %v584_v6  ;;  %v214_v22 = vshrl.u32 %v205_v19, 7  ;;  %v206_v30 = vand.u32 127, %v205_v19  ;;  %s433_s3 = sshll.u32 %s585_s0, 4  ;;  %s434_s3 = int_to_ptr.vmem [resolvable:$true] %s433_s3 }
  0x18   :  { %473 = vmatprep.subr.mxu0 %v582_v0  ;;  %478 = vmatprep.subr.mxu1 %v582_v0  ;;  %v226_v7 = vsel %vm208_vm2, 1, %v584_v6  ;;  %s529_s13 = scalar_lea.vmem %s434_s3, 32  ;;  %p534_p9 = scmp.lt.s32.totalorder %s434_s3, %s434_s3 }
  0x19   :  { %493 = vset.pattern.permute.xlu1 %v584_v6  ;;  %494 = vset.pattern.permute.xlu0 %v584_v6  ;;  %v215_v27 = vsub.s32 0, %v214_v22  ;;  %p530_p8 = scmp.ne.s32.totalorder %s434_s3, %s529_s13  ;;  %p535_p10 = scmp.lt.s32.totalorder %s529_s13, %s529_s13 }
  0x1a   :  { %466 = vmatmul.mubr.msk.f32.vlgmr.msra.gmra.mrb[0].mxu0 %vm37_vm1, %v36_v3  ;;  %471 = vmatmul.mubr.msk.f32.vlgmr.msra.gmra.mrb[0].mxu1 %vm37_vm1, %v36_v3 }
  0x1b   :  { %474 = vmatpush3.msra.mxu0 %v34_v1  ;;  %475 = vmatprep.mubr.msk.f32.mxu0 %vm583_vm0, %v582_v0  ;;  %p536_p11 = por %p535_p10, %p534_p9 }
  0x1c   :  { %479 = vmatpush3.msra.mxu1 %v35_v2  ;;  %480 = vmatprep.mubr.msk.f32.mxu1 %vm583_vm0, %v582_v0 }
  0x1d   :  { %211 = vperm.xlu1 %493, %v202_v4   ;;  %p537_p12 = pnand %p536_p11, %p530_p8 }
  0x21   :  { %218 = vperm.xlu1 %493, %v203_v8  }
  0x25   :  { %236 = vperm.xlu1 %493, %v227_v9  }
  0x9c   :  { %v212_v18 = vpop.permute.xlu1 %211 }
  0x9d   :  { %v216_v31 = vrot.slane %v212_v18, %v215_v27 }
  0x9f   :  { %vm224_vm5 = vcmp.lt.s32.totalorder %v206_v30, %v216_v31 }
  0xa0   :  { %v219_v24 = vpop.permute.xlu1 %218 }
  0xa1   :  { %v223_v32 = vrot.slane %v219_v24, %v215_v27 }
  0xa3   :  { %vm225_vm7 = vcmp.lt.s32.totalorder %v206_v30, %v223_v32 }
  0xa4   :  { %v237_v29 = vpop.permute.xlu1 %236 }
  0xa5   :  { %v241_v33 = vrot.slane %v237_v29, %v215_v27 }
  0xa7   :  { %vm243_vm8 = vcmp.eq.s32.totalorder %v241_v33, 1 }
  0xa8   :  { %vm245_vm10 = vmor %vm243_vm8, %vm225_vm7 }
  0xed   :  { %v110_v10 = vpop.f32.mrb[0].mxu0  ;;  %v183_v11 = vpop.f32.mrb[0].mxu1 }
  0xee   :  { %495 = vtanh.f32 %v110_v10  ;;  %v467_v12 = vpop.f32.mrb[1].mxu0  ;;  %v472_v13 = vpop.f32.mrb[1].mxu1 }
  0xef   :  { %497 = vtanh.f32 %v183_v11 }
  0xf8   :  { %v496_v14 = vpop.eup %495 }
  0xf9   :  { %v498_v15 = vpop.eup %497  ;;  %v190_v16 = vsel %vm189_vm4, %v496_v14, -inf }
  0xfa   :  { %191 = vmax.xlane.f32.xlu0 %v190_v16  ;;  %v193_v17 = vsel %vm189_vm4, %v498_v15, -inf }
  0xfe   :  { %194 = vmax.xlane.f32.xlu0 %v193_v17 }
 0x114   :  { %229 = vperm.xlu0 %494, %v226_v7  }
 0x187   :  { %v192_v20 = vpop.xlane.xlu0 %191 }
 0x188   :  { %v196_v21 = vsub.f32 %v496_v14, %v192_v20 }
 0x18a   :  { %v198_v23 = vmul.f32 1.442695, %v196_v21 }
 0x18b   :  { %v195_v25 = vpop.xlane.xlu0 %194 }
 0x18c   :  { %499 = vpow2.f32 %v198_v23  ;;  %v197_v26 = vsub.f32 %v498_v15, %v195_v25 }
 0x18e   :  { %v200_v28 = vmul.f32 1.442695, %v197_v26 }
 0x190   :  { %501 = vpow2.f32 %v200_v28 }
 0x193   :  { %v230_v34 = vpop.permute.xlu0 %229 }
 0x194   :  { %v234_v35 = vrot.slane %v230_v34, %v215_v27 }
 0x196   :  { %v500_v36 = vpop.eup %499  ;;  %vm242_vm6 = vcmp.eq.s32.totalorder %v234_v35, 1 }
 0x197   :  { %vm244_vm9 = vmor %vm242_vm6, %vm224_vm5 }
 0x198   :  { %v246_v37 = vsel %vm244_vm9, %v500_v36, 0.0 }
 0x199   :  { %v248_v38 = vsel %vm189_vm4, %v246_v37, 0.0 }
 0x19a   :  { %v502_v39 = vpop.eup %501  ;;  %249 = vadd.xlane.f32.xlu1 %v248_v38 }
 0x19b   :  { %v247_v40 = vsel %vm245_vm10, %v502_v39, 0.0 }
 0x19c   :  { %v251_v41 = vsel %vm189_vm4, %v247_v40, 0.0 }
 0x19e   :  { %252 = vadd.xlane.f32.xlu1 %v251_v41 }
 0x227   :  { %v250_v42 = vpop.xlane.xlu1 %249 }
 0x228   :  { %503 = vrcp.f32 %v250_v42 }
 0x22b   :  { %v253_v43 = vpop.xlane.xlu1 %252 }
 0x22c   :  { %505 = vrcp.f32 %v253_v43 }
 0x232   :  { %v504_v44 = vpop.eup %503 }
 0x233   :  { %v256_v45 = vmul.f32 %v504_v44, %v250_v42 }
 0x235   :  { %v258_v46 = vsub.f32 2.0, %v256_v45 }
 0x236   :  { %v506_v47 = vpop.eup %505 }
 0x237   :  { %v260_v48 = vmul.f32 %v504_v44, %v258_v46  ;;  %v257_v49 = vmul.f32 %v506_v47, %v253_v43 }
 0x239   :  { %v262_v50 = vmul.f32 %v260_v48, %v246_v37  ;;  %v259_v51 = vsub.f32 2.0, %v257_v49 }
 0x23b   :  { %414 = vst.msk [vmem:[#allocation8] sm:$0x1] %vm189_vm4, %v262_v50  ;;  %v261_v52 = vmul.f32 %v506_v47, %v259_v51  ;;  %476 = vmatmul.mubr.msk.f32.vlgmr.msra.gmra.mrb[2].mxu0 %vm264_vm11, %v262_v50 }
 0x23d   :  { %v263_v53 = vmul.f32 %v261_v52, %v247_v40 }
 0x23f   :  { %415 = vst.msk [vmem:[#allocation8 + $0x1] sm:$0x1] %vm189_vm4, %v263_v53  ;;  %481 = vmatmul.mubr.msk.f32.vlgmr.msra.gmra.mrb[2].mxu1 %vm264_vm11, %v263_v53 }
 0x240   :  { %540 = shalt.err (!%p537_p12)
}
 0x241   :  { %s541_s16 = scalar_lea.hbm %s682_s5, 32 }
 0x242   :  { %p542_p13 = scmp.ne.s32.totalorder %s682_s5, %s541_s16  ;;  %p545_p0 = scmp.lt.u32.totalorder %s541_s16, %s682_s5 }
 0x244   :  { %p547_p1 = pnand %p545_p0, %p542_p13 }
 0x246   :  { %550 = shalt.err (!%p547_p1)
}
 0x247   :  { %s586_s21 = smov 16   ;;  %s587_s22 = smov 1   ;;  %vm411_vm12 = vcmask 253952  }
 0x248   :  { %439 = dma.vmem_to_hbm [thread:$0]  %s434_s3, 32, %s682_s5, [#allocation9], %s586_s21, %s586_s21, %s587_s22  }
 0x249   :  { %s588_s25 = smov [#allocation7]  }
 0x24a   :  { %s421_s26 = sshll.u32 %s588_s25, 4  ;;  %s422_s26 = int_to_ptr.vmem [resolvable:$true] %s421_s26 }
 0x24b   :  { %s551_s27 = scalar_lea.vmem %s422_s26, 32  ;;  %p556_p3 = scmp.lt.s32.totalorder %s422_s26, %s422_s26 }
 0x24c   :  { %p552_p2 = scmp.ne.s32.totalorder %s422_s26, %s551_s27  ;;  %p557_p4 = scmp.lt.s32.totalorder %s551_s27, %s551_s27 }
 0x24e   :  { %p558_p5 = por %p557_p4, %p556_p3 }
 0x250   :  { %p559_p6 = pnand %p558_p5, %p552_p2 }
 0x30e   :  { %v334_v54 = vpop.f32.mrb[2].mxu0 }
 0x30f   :  { %412 = vst.msk [vmem:[#allocation7] sm:$0x1] %vm411_vm12, %v334_v54  ;;  %v477_v55 = vpop.f32.mrb[3].mxu0 }
 0x312   :  { %v407_v56 = vpop.f32.mrb[2].mxu1 }
 0x313   :  { %413 = vst.msk [vmem:[#allocation7 + $0x1] sm:$0x1] %vm411_vm12, %v407_v56  ;;  %v482_v57 = vpop.f32.mrb[3].mxu1 }
 0x314   :  { %562 = shalt.err (!%p559_p6)
}
 0x315   :  { %s563_s5 = scalar_lea.hbm %s681_s4, 32 }
 0x316   :  { %p564_p7 = scmp.ne.s32.totalorder %s681_s4, %s563_s5  ;;  %p567_p8 = scmp.lt.u32.totalorder %s563_s5, %s681_s4 }
 0x318   :  { %p569_p9 = pnand %p567_p8, %p564_p7 }
 0x31a   :  { %572 = shalt.err (!%p569_p9)
}
 0x31b   :  { %427 = dma.vmem_to_hbm [thread:$0]  %s422_s26, 32, %s681_s4, [#allocation6], %s586_s21, %s586_s21, %s587_s22  }
 0x31c   :  { %575 = dma.done.wait [#allocation6], 32  }
 0x31d   :  { %576 = vsyncadd [#allocation6], 4294967264 }
 0x31e   :  { %577 = dma.done.wait [#allocation9], 32  }
 0x31f   :  { %578 = vsyncadd [#allocation9], 4294967264 }
 0x320   :  { %446 = vsyncpa [#allocation5], 1 }
 0x321   :  { %447 = vsyncpa [#allocation6], 1 }
 0x322   :  { %448 = vsyncpa [#allocation9], 1 }

</bundles_post_ra>
